<compile_context>
chip_gen: v7x
topology: tpu7x:2x2x1
jax: 0.10.0
libtpu: 0.0.40
codegen_flags: <defaults>
</compile_context>

<pallas_src>
import functools

import jax
import jax.numpy as jnp
from jax import lax
from jax.experimental import pallas as pl
from jax.experimental.pallas import tpu as pltpu

_MASK_FILL = -1e30  # finite large-negative fill (avoids NaN for fully-masked rows)


def _cdiv(a, b):
    return -(-a // b)


def _device_vmem_bytes():
    """Physical VMEM capacity; conservative 64 MiB (v7x per-TC) fallback."""
    try:
        return int(pltpu.get_tpu_info().vmem_capacity_bytes)
    except Exception:
        return 64 << 20


def _qk_scores(q, k, inv_temperature):
    # Fold 1/temperature into the q tile; keep native dtype for the MXU feed.
    q_scaled = q * jnp.asarray(inv_temperature, q.dtype)
    # q @ k^T without materializing a transpose: contract dim 1 of both.
    return lax.dot_general(
        q_scaled, k,
        dimension_numbers=(((1,), (1,)), ((), ())),
        preferred_element_type=jnp.float32,
    )


def _refined_reciprocal(x):
    # EUP approx reciprocal (otherwise-idle slot) + one Newton step for full
    # f32 accuracy; refinement only touches (TQ, 1) elements.
    r = pl.reciprocal(x, approx=True)
    return r * (2.0 - x * r)


def _softmax_lastdim(scores):
    s_max = jnp.max(scores, axis=-1, keepdims=True)
    e = jnp.exp(scores - s_max)
    denom = jnp.sum(e, axis=-1, keepdims=True)
    return e * _refined_reciprocal(denom)


# ----------------------------------------------------------------------------
# Kernels
# ----------------------------------------------------------------------------

def _sdpa_single_pass_kernel(*refs, inv_temperature, has_mask, write_attn):
    """Full-Lk single pass; optionally writes the attention matrix."""
    q_ref, k_ref, v_ref = refs[0], refs[1], refs[2]
    idx = 3
    m_ref = None
    if has_mask:
        m_ref = refs[idx]
        idx += 1
    out_ref = refs[idx]
    attn_ref = refs[idx + 1] if write_attn else None

    q = q_ref[0]          # (TQ, Dk) native dtype
    k = k_ref[0]          # (Lk, Dk)
    v = v_ref[0]          # (Lk, Dv)

    scores = _qk_scores(q, k, inv_temperature)            # (TQ, Lk) f32
    if has_mask:
        scores = jnp.where(m_ref[0] != 0, _MASK_FILL, scores)
    attn = _softmax_lastdim(scores)                       # (TQ, Lk) f32

    # TODO(synk): nn.Dropout(attn_dropout) — identity in eval mode; training
    # dropout intentionally not applied.

    out = jnp.dot(attn.astype(v.dtype), v, preferred_element_type=jnp.float32)
    out_ref[0] = out.astype(out_ref.dtype)
    if write_attn:
        attn_ref[0] = attn.astype(attn_ref.dtype)


def _sdpa_flash_kernel(*refs, inv_temperature, has_mask):
    """Lk-tiled online-softmax (flash) variant; out-only path."""
    q_ref, k_ref, v_ref = refs[0], refs[1], refs[2]
    idx = 3
    m_ref = None
    if has_mask:
        m_ref = refs[idx]
        idx += 1
    out_ref = refs[idx]
    m_sc, l_sc, acc_sc = refs[idx + 1:idx + 4]

    j = pl.program_id(2)

    @pl.when(j == 0)
    def _():
        m_sc[...] = jnp.full_like(m_sc, -jnp.inf)
        l_sc[...] = jnp.zeros_like(l_sc)
        acc_sc[...] = jnp.zeros_like(acc_sc)

    q = q_ref[0]          # (TQ, Dk)
    k = k_ref[0]          # (TK, Dk)
    v = v_ref[0]          # (TK, Dv)

    s = _qk_scores(q, k, inv_temperature)                 # (TQ, TK) f32
    if has_mask:
        s = jnp.where(m_ref[0] != 0, _MASK_FILL, s)

    m_prev = m_sc[...]
    m_new = jnp.maximum(m_prev, jnp.max(s, axis=-1, keepdims=True))
    alpha = jnp.exp(m_prev - m_new)
    p = jnp.exp(s - m_new)
    l_sc[...] = alpha * l_sc[...] + jnp.sum(p, axis=-1, keepdims=True)
    acc_sc[...] = alpha * acc_sc[...] + jnp.dot(
        p.astype(v.dtype), v, preferred_element_type=jnp.float32)
    m_sc[...] = m_new

    # TODO(synk): dropout — identity in eval mode.

    @pl.when(j == pl.num_programs(2) - 1)
    def _():
        out_ref[0] = (acc_sc[...] * _refined_reciprocal(l_sc[...])
                      ).astype(out_ref.dtype)


# ----------------------------------------------------------------------------
# VMEM budgeting & tile selection
# ----------------------------------------------------------------------------

def _single_pass_vmem(tq, lk, dk, dv, itemsize, attn_itemsize, has_mask,
                      write_attn):
    buf = 2  # BlockSpec double-buffering
    total = buf * (tq * dk + lk * dk + lk * dv + tq * dv) * itemsize
    if has_mask:
        total += buf * tq * lk * 1            # int8 mask
    if write_attn:
        total += buf * tq * lk * attn_itemsize
    total += 4 * tq * lk * 4                  # f32 intermediates + slack
    return total


def _flash_vmem(tq, tk, dk, dv, itemsize, has_mask):
    buf = 2
    total = buf * (tq * dk + tk * dk + tk * dv + tq * dv) * itemsize
    if has_mask:
        total += buf * tq * tk * 1
    total += 4 * tq * tk * 4                  # f32 intermediates + slack
    total += (tq * dv + 2 * tq) * 4           # acc / m / l scratch
    return total


def _pick_q_tile(lq, max_tile, fits):
    """Prefer multiples of 128 stepping down; never silently blow the budget."""
    if lq <= max_tile and fits(lq):
        return lq
    candidates = list(range((min(max_tile, lq) // 128) * 128, 127, -128))
    candidates += [64, 32, 16, 8]
    for c in candidates:                       # exact divisors first
        if c <= lq and lq % c == 0 and fits(c):
            return c
    for c in candidates:                       # else cdiv grid (partial last tile)
        if c <= lq and fits(c):
            return c
    return min(8, lq)


def _pick_k_tile(lk, max_tile, has_mask, fits):
    """Lk tile must divide Lk (no read-padding of the softmax axis)."""
    max_tile = min(max_tile, lk)
    if lk <= max_tile and fits(lk):
        return lk
    cands = list(range((max_tile // 128) * 128, 127, -128))
    if not has_mask:  # mask block last-dim must be a multiple of 128 or full
        cands += [c for c in (64, 32, 16, 8) if c <= max_tile]
    for c in cands:
        if lk % c == 0 and fits(c):
            return c
    return lk  # degenerate: single K tile


# ----------------------------------------------------------------------------
# Wrapper
# ----------------------------------------------------------------------------

def scaled_dot_product_attention(q, k, v, temperature, mask=None, *,
                                 return_attn=True, attn_dtype=None,
                                 block_q=None, block_k=None,
                                 flash_lk_threshold=2048):
    """q: [B, Lq, Dk], k: [B, Lk, Dk], v: [B, Lk, Dv], mask: [B, Lq, Lk] or None.

    return_attn=False compiles an out-only kernel (no B*Lq*Lk HBM writeback),
    switching to an Lk-tiled flash variant for long Lk.
    attn_dtype (e.g. jnp.bfloat16) shrinks the attn write stream when it must
    be returned.  Lane-density note: Dk/Dv >= 128 (fold heads wrapper-side) is
    preferred for unmasked vector stores / full MXU contraction depth.
    """
    B, Lq, Dk = q.shape
    _, Lk, _ = k.shape
    Dv = v.shape[-1]

    has_mask = mask is not None
    attn_dt = jnp.dtype(attn_dtype) if attn_dtype is not None else q.dtype
    itemsize = jnp.dtype(q.dtype).itemsize
    attn_itemsize = attn_dt.itemsize if return_attn else 0
    inv_temperature = 1.0 / float(temperature)

    # --- VMEM budget (adapts v5e/v6e: 128 MiB vs v7x: 64 MiB per-TC) ---------
    vmem_cap = _device_vmem_bytes()
    budget = min((vmem_cap * 3) // 4, 100 << 20)
    vmem_limit = int(min(budget + (8 << 20), vmem_cap - (4 << 20)))
    vmem_limit = max(vmem_limit, 32 << 20)

    if block_q is None:
        block_q = 512 if vmem_cap >= (96 << 20) else 128

    use_flash = (not return_attn) and (block_k is not None
                                       or Lk >= flash_lk_threshold)

    if use_flash:
        fits_k = lambda t: _flash_vmem(128, t, Dk, Dv, itemsize,
                                       has_mask) <= budget
        tk = _pick_k_tile(Lk, block_k if block_k is not None else 512,
                          has_mask, fits_k)
        fits_q = lambda t: _flash_vmem(t, tk, Dk, Dv, itemsize,
                                       has_mask) <= budget
        tq = _pick_q_tile(Lq, block_q, fits_q)
    else:
        fits_q = lambda t: _single_pass_vmem(t, Lk, Dk, Dv, itemsize,
                                             attn_itemsize, has_mask,
                                             return_attn) <= budget
        tq = _pick_q_tile(Lq, block_q, fits_q)

    n_q = _cdiv(Lq, tq)
    # v7x megacore: make sure there are >=2 parallel grid units when possible.
    if B * n_q < 2 and Lq > 8 and tq > 8:
        half = max(8, ((tq // 2 + 7) // 8) * 8)
        if half < tq:
            tq = half
            n_q = _cdiv(Lq, tq)

    out_struct = jax.ShapeDtypeStruct((B, Lq, Dv), q.dtype)

    if use_flash:
        n_k = _cdiv(Lk, tk)
        grid = (B, n_q, n_k)
        in_specs = [
            pl.BlockSpec((1, tq, Dk), lambda b, i, j: (b, i, 0)),
            pl.BlockSpec((1, tk, Dk), lambda b, i, j: (b, j, 0)),
            pl.BlockSpec((1, tk, Dv), lambda b, i, j: (b, j, 0)),
        ]
        args = [q, k, v]
        if has_mask:
            in_specs.append(pl.BlockSpec((1, tq, tk), lambda b, i, j: (b, i, j)))
            args.append(mask.astype(jnp.int8))
        out_specs = pl.BlockSpec((1, tq, Dv), lambda b, i, j: (b, i, 0))
        out_shapes = out_struct
        scratch = [pltpu.VMEM((tq, 1), jnp.float32),
                   pltpu.VMEM((tq, 1), jnp.float32),
                   pltpu.VMEM((tq, Dv), jnp.float32)]
        dims = ("parallel", "parallel", "arbitrary")
        kernel = functools.partial(_sdpa_flash_kernel,
                                   inv_temperature=inv_temperature,
                                   has_mask=has_mask)
    else:
        grid = (B, n_q)
        in_specs = [
            pl.BlockSpec((1, tq, Dk), lambda b, i: (b, i, 0)),
            pl.BlockSpec((1, Lk, Dk), lambda b, i: (b, 0, 0)),   # K resident per batch
            pl.BlockSpec((1, Lk, Dv), lambda b, i: (b, 0, 0)),   # V resident per batch
        ]
        args = [q, k, v]
        if has_mask:
            in_specs.append(pl.BlockSpec((1, tq, Lk), lambda b, i: (b, i, 0)))
            args.append(mask.astype(jnp.int8))
        out_spec = pl.BlockSpec((1, tq, Dv), lambda b, i: (b, i, 0))
        if return_attn:
            out_specs = [out_spec,
                         pl.BlockSpec((1, tq, Lk), lambda b, i: (b, i, 0))]
            out_shapes = (out_struct,
                          jax.ShapeDtypeStruct((B, Lq, Lk), attn_dt))
        else:
            out_specs = out_spec
            out_shapes = out_struct
        scratch = []
        dims = ("parallel", "parallel")
        kernel = functools.partial(_sdpa_single_pass_kernel,
                                   inv_temperature=inv_temperature,
                                   has_mask=has_mask,
                                   write_attn=return_attn)

    result = pl.pallas_call(
        kernel,
        grid_spec=pltpu.PrefetchScalarGridSpec(
            num_scalar_prefetch=0,
            grid=grid,
            in_specs=in_specs,
            out_specs=out_specs,
            scratch_shapes=scratch,
        ),
        out_shape=out_shapes,
        compiler_params=pltpu.CompilerParams(
            dimension_semantics=dims,
            vmem_limit_bytes=vmem_limit,
        ),
    )(*args)

    if return_attn:
        out, attn = result
        return out, attn
    return result


# ----------------------------------------------------------------------------
# Reference & test
# ----------------------------------------------------------------------------

def _reference(q, k, v, temperature, mask=None):
    attn = jnp.einsum("bqd,bkd->bqk", q, k) / temperature
    if mask is not None:
        attn = jnp.where(mask, -jnp.inf, attn)
    attn = jax.nn.softmax(attn, axis=2)
    out = jnp.einsum("bqk,bkd->bqd", attn, v)
    return out, attn


if __name__ == "__main__":
    key = jax.random.PRNGKey(0)
    kq, kk, kv, km = jax.random.split(key, 4)

    B, Lq, Lk, Dk, Dv = 2, 8, 8, 32, 32
    temperature = float(Dk) ** 0.5

    q = jax.random.normal(kq, (B, Lq, Dk), dtype=jnp.float32)
    k = jax.random.normal(kk, (B, Lk, Dk), dtype=jnp.float32)
    v = jax.random.normal(kv, (B, Lk, Dv), dtype=jnp.float32)
    # Sparse random mask (never fully masks a row at these shapes/seed).
    mask = jax.random.bernoulli(km, 0.2, (B, Lq, Lk))

    # 1) Masked, full (out, attn) — module semantics.
    out, attn = scaled_dot_product_attention(q, k, v, temperature, mask=mask)
    out = jax.block_until_ready(out)
    attn = jax.block_until_ready(attn)
    ref_out, ref_attn = _reference(q, k, v, temperature, mask=mask)
    assert jnp.allclose(out, ref_out, atol=1e-5, rtol=1e-5)
    assert jnp.allclose(attn, ref_attn, atol=1e-5, rtol=1e-5)

    # 2) No mask, full (out, attn).
    out2, attn2 = scaled_dot_product_attention(q, k, v, temperature, mask=None)
    out2 = jax.block_until_ready(out2)
    attn2 = jax.block_until_ready(attn2)
    ref_out2, ref_attn2 = _reference(q, k, v, temperature, mask=None)
    assert jnp.allclose(out2, ref_out2, atol=1e-5, rtol=1e-5)
    assert jnp.allclose(attn2, ref_attn2, atol=1e-5, rtol=1e-5)

    # 3) Masked, out-only fast path (no attn HBM writeback).
    out3 = scaled_dot_product_attention(q, k, v, temperature, mask=mask,
                                        return_attn=False)
    out3 = jax.block_until_ready(out3)
    assert jnp.allclose(out3, ref_out, atol=1e-5, rtol=1e-5)

    # 4) No mask, out-only, forced Lk-tiled flash path (online softmax).
    B4, Lq4, Lk4 = 2, 16, 16
    q4 = jax.random.normal(kq, (B4, Lq4, Dk), dtype=jnp.float32)
    k4 = jax.random.normal(kk, (B4, Lk4, Dk), dtype=jnp.float32)
    v4 = jax.random.normal(kv, (B4, Lk4, Dv), dtype=jnp.float32)
    out4 = scaled_dot_product_attention(q4, k4, v4, temperature,
                                        return_attn=False, block_k=8)
    out4 = jax.block_until_ready(out4)
    ref_out4, _ = _reference(q4, k4, v4, temperature)
    assert jnp.allclose(out4, ref_out4, atol=1e-5, rtol=1e-5)

    print("KERNEL_OK")
</pallas_src>

<mosaic_0001>
module attributes {stable_mosaic.version = 11 : i64} {
  func.func @_sdpa_single_pass_kernel(%arg0: i32, %arg1: i32, %arg2: memref<1x8x32xf32, #tpu.memory_space<vmem>>, %arg3: memref<1x8x32xf32, #tpu.memory_space<vmem>>, %arg4: memref<1x8x32xf32, #tpu.memory_space<vmem>>, %arg5: memref<1x8x8xi8, #tpu.memory_space<vmem>>, %arg6: memref<1x8x32xf32, #tpu.memory_space<vmem>>, %arg7: memref<1x8x8xf32, #tpu.memory_space<vmem>>) attributes {dimension_semantics = [#tpu.dimension_semantics<parallel>, #tpu.dimension_semantics<parallel>], iteration_bounds = array<i64: 2, 1>, scalar_prefetch = 0 : i64, scratch_operands = 0 : i64, tpu.core_type = #tpu.core_type<tc>, window_params = [{transform_indices = @transform_0, window_bounds = array<i64: 1, 8, 32>}, {transform_indices = @transform_1, window_bounds = array<i64: 1, 8, 32>}, {transform_indices = @transform_2, window_bounds = array<i64: 1, 8, 32>}, {transform_indices = @transform_3, window_bounds = array<i64: 1, 8, 8>}, {transform_indices = @transform_4, window_bounds = array<i64: 1, 8, 32>}, {transform_indices = @transform_5, window_bounds = array<i64: 1, 8, 8>}]} {
    %c0 = arith.constant 0 : index
    %c0_0 = arith.constant 0 : index
    %c0_1 = arith.constant 0 : index
    %0 = vector.load %arg2[%c0, %c0_0, %c0_1] : memref<1x8x32xf32, #tpu.memory_space<vmem>>, vector<1x8x32xf32>
    %1 = vector.shape_cast %0 : vector<1x8x32xf32> to vector<8x32xf32>
    %c0_2 = arith.constant 0 : index
    %c0_3 = arith.constant 0 : index
    %c0_4 = arith.constant 0 : index
    %2 = vector.load %arg3[%c0_2, %c0_3, %c0_4] : memref<1x8x32xf32, #tpu.memory_space<vmem>>, vector<1x8x32xf32>
    %3 = vector.shape_cast %2 : vector<1x8x32xf32> to vector<8x32xf32>
    %c0_5 = arith.constant 0 : index
    %c0_6 = arith.constant 0 : index
    %c0_7 = arith.constant 0 : index
    %4 = vector.load %arg4[%c0_5, %c0_6, %c0_7] : memref<1x8x32xf32, #tpu.memory_space<vmem>>, vector<1x8x32xf32>
    %5 = vector.shape_cast %4 : vector<1x8x32xf32> to vector<8x32xf32>
    %cst = arith.constant 0.176776692 : f32
    %6 = vector.broadcast %cst : f32 to vector<8x32xf32>
    %7 = arith.mulf %1, %6 : vector<8x32xf32>
    %cst_8 = arith.constant dense<0.000000e+00> : vector<8x8xf32>
    %8 = tpu.matmul %7, %3, %cst_8 {dimension_numbers = #tpu.dot_dimension_numbers<[1], [1], [0], [0], [0, 0, 1, 0], [], []>} : vector<8x32xf32>, vector<8x32xf32>, vector<8x8xf32> -> vector<8x8xf32>
    %c0_9 = arith.constant 0 : index
    %c0_10 = arith.constant 0 : index
    %c0_11 = arith.constant 0 : index
    %9 = vector.load %arg5[%c0_9, %c0_10, %c0_11] : memref<1x8x8xi8, #tpu.memory_space<vmem>>, vector<1x8x8xi8>
    %10 = vector.shape_cast %9 : vector<1x8x8xi8> to vector<8x8xi8>
    %c0_i8 = arith.constant 0 : i8
    %11 = vector.broadcast %c0_i8 : i8 to vector<8x8xi8>
    %12 = arith.cmpi ne, %10, %11 : vector<8x8xi8>
    %cst_12 = arith.constant -1.000000e+30 : f32
    %13 = vector.broadcast %cst_12 : f32 to vector<8x8xf32>
    %14 = arith.select %12, %13, %8 : vector<8x8xi1>, vector<8x8xf32>
    %cst_13 = arith.constant dense<0xFF800000> : vector<8xf32>
    %15 = vector.multi_reduction <maximumf>, %14, %cst_13 [1] : vector<8x8xf32> to vector<8xf32>
    %16 = vector.shape_cast %15 : vector<8xf32> to vector<8x1xf32>
    %17 = vector.broadcast %16 : vector<8x1xf32> to vector<8x8xf32>
    %18 = arith.subf %14, %17 : vector<8x8xf32>
    %19 = math.exp %18 : vector<8x8xf32>
    %cst_14 = arith.constant dense<0.000000e+00> : vector<8xf32>
    %20 = vector.multi_reduction <add>, %19, %cst_14 [1] : vector<8x8xf32> to vector<8xf32>
    %21 = vector.shape_cast %20 : vector<8xf32> to vector<8x1xf32>
    %22 = tpu.reciprocal %21 {approx = true} : vector<8x1xf32> -> vector<8x1xf32>
    %23 = arith.mulf %21, %22 : vector<8x1xf32>
    %cst_15 = arith.constant 2.000000e+00 : f32
    %24 = vector.broadcast %cst_15 : f32 to vector<8x1xf32>
    %25 = arith.subf %24, %23 : vector<8x1xf32>
    %26 = arith.mulf %22, %25 : vector<8x1xf32>
    %27 = vector.broadcast %26 : vector<8x1xf32> to vector<8x8xf32>
    %28 = arith.mulf %19, %27 : vector<8x8xf32>
    %cst_16 = arith.constant dense<0.000000e+00> : vector<8x32xf32>
    %29 = tpu.matmul %28, %5, %cst_16 {dimension_numbers = #tpu.dot_dimension_numbers<[1], [0], [0], [1], [0, 0, 1, 1], [], []>} : vector<8x8xf32>, vector<8x32xf32>, vector<8x32xf32> -> vector<8x32xf32>
    %c0_17 = arith.constant 0 : index
    %c0_18 = arith.constant 0 : index
    %c0_19 = arith.constant 0 : index
    %30 = vector.load %arg6[%c0_17, %c0_18, %c0_19] : memref<1x8x32xf32, #tpu.memory_space<vmem>>, vector<1x8x32xf32>
    %31 = vector.shape_cast %30 : vector<1x8x32xf32> to vector<8x32xf32>
    %32 = vector.shape_cast %29 : vector<8x32xf32> to vector<1x8x32xf32>
    tpu.vector_store %arg6[%c0_17, %c0_18, %c0_19], %32 {strides = array<i32>} : memref<1x8x32xf32, #tpu.memory_space<vmem>>, vector<1x8x32xf32>,
    %c0_20 = arith.constant 0 : index
    %c0_21 = arith.constant 0 : index
    %c0_22 = arith.constant 0 : index
    %33 = vector.load %arg7[%c0_20, %c0_21, %c0_22] : memref<1x8x8xf32, #tpu.memory_space<vmem>>, vector<1x8x8xf32>
    %34 = vector.shape_cast %33 : vector<1x8x8xf32> to vector<8x8xf32>
    %35 = vector.shape_cast %28 : vector<8x8xf32> to vector<1x8x8xf32>
    tpu.vector_store %arg7[%c0_20, %c0_21, %c0_22], %35 {strides = array<i32>} : memref<1x8x8xf32, #tpu.memory_space<vmem>>, vector<1x8x8xf32>,
    return
  }
  func.func @transform_0(%arg0: i32, %arg1: i32) -> (i32, i32, i32) {
    %c0_i32 = arith.constant 0 : i32
    %c0_i32_0 = arith.constant 0 : i32
    return %arg0, %arg1, %c0_i32 : i32, i32, i32
  }
  func.func @transform_1(%arg0: i32, %arg1: i32) -> (i32, i32, i32) {
    %c0_i32 = arith.constant 0 : i32
    %c0_i32_0 = arith.constant 0 : i32
    %c0_i32_1 = arith.constant 0 : i32
    return %arg0, %c0_i32, %c0_i32_0 : i32, i32, i32
  }
  func.func @transform_2(%arg0: i32, %arg1: i32) -> (i32, i32, i32) {
    %c0_i32 = arith.constant 0 : i32
    %c0_i32_0 = arith.constant 0 : i32
    %c0_i32_1 = arith.constant 0 : i32
    return %arg0, %c0_i32, %c0_i32_0 : i32, i32, i32
  }
  func.func @transform_3(%arg0: i32, %arg1: i32) -> (i32, i32, i32) {
    %c0_i32 = arith.constant 0 : i32
    %c0_i32_0 = arith.constant 0 : i32
    return %arg0, %arg1, %c0_i32 : i32, i32, i32
  }
  func.func @transform_4(%arg0: i32, %arg1: i32) -> (i32, i32, i32) {
    %c0_i32 = arith.constant 0 : i32
    %c0_i32_0 = arith.constant 0 : i32
    return %arg0, %arg1, %c0_i32 : i32, i32, i32
  }
  func.func @transform_5(%arg0: i32, %arg1: i32) -> (i32, i32, i32) {
    %c0_i32 = arith.constant 0 : i32
    %c0_i32_0 = arith.constant 0 : i32
    return %arg0, %arg1, %c0_i32 : i32, i32, i32
  }
}

</mosaic_0001>

<bundles_post_ra>
// kernel: tpu_custom_call.1
= control target key start
LH: loop header
LB: loop body
LE: loop exit
PB: predicated region body
PF: predicated region fallthrough
CT: control target
= control target key end

     0   :  { %s1429_s0 = inlined_call_operand.hbm [shape: f32[2,8,32], index: 0, kind: input, shape index: {}]   ;;  %s1430_s1 = inlined_call_operand.hbm [shape: f32[2,8,32], index: 1, kind: input, shape index: {}]   ;;  %s1431_s2 = inlined_call_operand.hbm [shape: f32[2,8,32], index: 2, kind: input, shape index: {}]   ;;  %s1432_s3 = inlined_call_operand.vmem [shape: s8[2,8,8], index: 3, kind: input, shape index: {}]   ;;  %s1433_s4 = inlined_call_operand.hbm [shape: f32[2,8,32], index: 4, kind: output, shape index: {0}]   ;;  %s1434_s5 = inlined_call_operand.hbm [shape: f32[2,8,8], index: 5, kind: output, shape index: {1}]  }
   0x1   :  { %1444 = sst [smem:[#allocation20_spill]] %s1430_s1 }
   0x2   :  { %11 = vsyncpa [#allocation3], 0 }
   0x3   :  { %13 = vsyncpa [#allocation3 + $0x1], 0 }
   0x4   :  { %14 = vsyncpa [#allocation6], 0 }
   0x5   :  { %16 = vsyncpa [#allocation6 + $0x1], 0 }
   0x6   :  { %17 = vsyncpa [#allocation4], 0 }
   0x7   :  { %19 = vsyncpa [#allocation4 + $0x1], 0 }
   0x8   :  { %20 = vsyncpa [#allocation10], 0 }
   0x9   :  { %22 = vsyncpa [#allocation10 + $0x1], 0  ;;  %s1125_s18 = smov 0   ;;  %s1127_s19 = smov 0  }
   0xa   :  { %s1129_s20 = smov 0   ;;  %s1131_s21 = smov 0  }
   0xb   :  { %s1133_s22 = smov 0   ;;  %s1135_s23 = smov 0  }
   0xc LB: > { %1445 = sst [smem:[#allocation15_spill]] %s1081_s22  ;;  %s1156_s24 = sadd.s32 4294967295, %s1085_s23   ;;  %s1085_s23 = sphi %s1135_s23, %s28_s23   ;;  %s1081_s22 = sphi %s1133_s22, %s1471_s22   ;;  %s1077_s21 = sphi %s1131_s21, %s1470_s21   ;;  %s1073_s20 = sphi %s1129_s20, %s1474_s20   ;;  %s1069_s19 = sphi %s1127_s19, %s1473_s19   ;;  %s1065_s18 = sphi %s1125_s18, %s1472_s18  }
   0xd   : > { %1446 = sst [smem:[#allocation16_spill]] %s1085_s23  ;;  %s754_s25 = sadd.s32 4294967294, %s1085_s23  }
   0xe   : > { %s40_s26 = sadd.s32 1, %s1081_s22  ;;  %s49_s27 = sadd.s32 1, %s1073_s20 }
   0xf   : > { %p42_p0 = scmp.ge.s32.totalorder %s40_s26, 2  ;;  %p56_p1 = scmp.ne.s32.totalorder %s1073_s20, %s1069_s19 }
  0x10   : > { %p57_p2 = scmp.eq.s32.totalorder %s1085_s23, 0  ;;  %p62_p3 = scmp.ne.s32.totalorder %s1069_s19, %s1065_s18 }
  0x11   : > { %s1476_s26 = smov (%p42_p0, %s40_s26), 0  ;;  %p63_p5 = scmp.eq.s32.totalorder %s1156_s24, 0 }
  0x12   : > { %1447 = sst [smem:[#allocation17_spill]] %s1476_s26  ;;  %p1168_p4 = por %p57_p2, %p56_p1 }
  0x13   : > { %s44_s29 = ssub.s32 %s1081_s22, %s1476_s26  ;;  %p168_p6 = scmp.eq.s32.totalorder %s1156_s24, 1 }
  0x14   : > { %p47_p7 = scmp.eq.s32.totalorder %s44_s29, 0  ;;  %p1176_p8 = por %p63_p5, %p62_p3 }
  0x15   : > { %p1180_p9 = por %p168_p6, %p56_p1  ;;  %p174_p10 = scmp.eq.s32.totalorder %s754_s25, 1 }
  0x16   : > { %s1449_s30 = scalar_select %p1176_p8, 1, 0 }
  0x17   : > { %s1450_s6 = scalar_select %p1180_p9, 1, 0 }
  0x18   : > { %s1185_s7 = scalar_select %p47_p7, %s1073_s20, %s49_s27  }
  0x19   : > { %p1187_p11 = por %p174_p10, %p62_p3  ;;  %p820_p13 = scmp.lt.s32.totalorder %s1085_s23, 2 }
  0x1a   : > { %1451 = sst [smem:[#allocation18_spill]] %s1185_s7  ;;  %s1435_s9 = sand.u32 1, %s1073_s20  }
  0x1b   : > { %s1452_s8 = scalar_select %p1187_p11, 1, 0 }
  0x1c   : > { %s1196_s10 = sshll.u32 %s1435_s9, 3  ;;  %s1199_s11 = sshll.u32 %s1081_s22, 7 }
  0x1d   : > { %1453 = sst [smem:[#allocation19_spill]] %s1452_s8  ;;  %p1203_p0 = pnand %p820_p13, %p1168_p4 }
  0x1e   : > { %s241_s13 = sand.u32 1, %s1085_s23   ;;  %s1455_s1 = sld [smem:[#allocation20_spill]] }
  0x1f   : > { %s1454_s12 = scalar_select %p1203_p0, 1, 0 }
  0x20   : > { %s245_s17 = scalar_lea.vmem [#allocation5], %s1196_s10  ;;  %s1219_s27 = scalar_lea.sflag [#allocation6], %s241_s13 }
  0x21   : > { %s252_s25 = sshll.u32 %s245_s17, 4  ;;  %p1225_p4 = pneg %p1203_p0  ;;  %s1216_s25 = int_to_ptr.vmem [resolvable:$true] %s252_s25 }
  0x24   : > { %s1212_s16 = scalar_lea.hbm %s1455_s1, %s1199_s11  ;;  %s882_s17 = scalar_lea.hbm %s1455_s1, 256 }
  0x25   : > { %s877_s28 = scalar_lea.hbm %s1212_s16, 128  ;;  %p883_p7 = scmp.lt.u32.totalorder %s1212_s16, %s1455_s1 }
  0x26   : > { %p878_p3 = scmp.ne.s32.totalorder %s1212_s16, %s877_s28  ;;  %p884_p10 = scmp.lt.u32.totalorder %s882_s17, %s877_s28 }
  0x27   : > { %p886_p12 = scmp.lt.u32.totalorder %s877_s28, %s1212_s16 }
  0x28   : > { %p880_p5 = pnand %p1225_p4, %p878_p3  ;;  %p885_p13 = por %p884_p10, %p883_p7 }
  0x2a   : > { %p881_p6 = pneg %p880_p5  ;;  %p887_p1 = por %p886_p12, %p885_p13 }
  0x2c   : > { %p888_p2 = pnand %p887_p1, %p881_p6 }
  0x2e   : > { %891 = shalt.err (!%p888_p2)
}
  0x2f   : > { %s892_s13 = scalar_lea.vmem %s1216_s25, 128  ;;  %s1087_s14 = smov [#allocation5]  }
  0x30   : > { %p893_p3 = scmp.ne.s32.totalorder %s1216_s25, %s892_s13  ;;  %s897_s15 = sshll.u32 %s1087_s14, 4  ;;  %s898_s15 = int_to_ptr.vmem [resolvable:$false] %s897_s15 }
  0x31   : > { %s899_s26 = scalar_lea.vmem %s898_s15, 256  ;;  %p900_p9 = scmp.lt.s32.totalorder %s1216_s25, %s898_s15 }
  0x32   : > { %p895_p5 = pnand %p893_p3, %p1225_p4  ;;  %p901_p8 = scmp.lt.s32.totalorder %s899_s26, %s892_s13 }
  0x34   : > { %p896_p11 = pneg %p895_p5  ;;  %p902_p7 = por %p901_p8, %p900_p9 }
  0x36   : > { %p903_p10 = pnand %p902_p7, %p896_p11 }
  0x38   : > { %906 = shalt.err (!%p903_p10)
}
  0x39   : > { %809 = dma.hbm_to_vmem [thread:$0]  (!%p1203_p0), %s1212_s16, 128, %s1216_s25, %s1219_s27  }
  0x3a   : > { %p1457_p12 = scmp.lt.s32.totalorder %s1085_s23, 3  ;;  %p1458_p1 = scmp.ge.s32.totalorder %s1085_s23, 1 }
  0x3b   : > { %s1261_s13 = scalar_lea.hbm %s1429_s0, %s1199_s11  ;;  %s226_s14 = scalar_lea.vmem [#allocation2], %s1196_s10 }
  0x3c   : > { %p1253_p2 = pnand %p1458_p1, %p1457_p12  ;;  %s234_s15 = sshll.u32 %s226_s14, 4  ;;  %s1264_s15 = int_to_ptr.vmem [resolvable:$true] %s234_s15 }
  0x3d   : > { %s1270_s26 = scalar_lea.hbm %s1431_s2, %s1199_s11  ;;  %s1460_s1 = sand.u32 1, %s1073_s20  }
  0x3e   : > { %s1459_s9 = scalar_select %p1253_p2, 1, 0 }
  0x3f   : > { %s223_s22 = scalar_lea.sflag [#allocation3], %s1460_s1  ;;  %s907_s7 = scalar_lea.hbm %s1261_s13, 128 }
  0x40   : > { %p908_p8 = scmp.ne.s32.totalorder %s1261_s13, %s907_s7  ;;  %s912_s23 = scalar_lea.hbm %s1429_s0, 256 }
  0x41   : > { %p913_p6 = scmp.lt.u32.totalorder %s1261_s13, %s1429_s0  ;;  %p914_p13 = scmp.lt.u32.totalorder %s912_s23, %s907_s7 }
  0x42   : > { %p910_p9 = pnand %p908_p8, %p1225_p4  ;;  %p916_p5 = scmp.lt.u32.totalorder %s907_s7, %s1261_s13 }
  0x43   : > { %p915_p3 = por %p914_p13, %p913_p6 }
  0x44   : > { %p911_p11 = pneg %p910_p9 }
  0x45   : > { %p917_p7 = por %p916_p5, %p915_p3 }
  0x47   : > { %p918_p10 = pnand %p917_p7, %p911_p11 }
  0x49   : > { %921 = shalt.err (!%p918_p10)
}
  0x4a   : > { %s922_s1 = scalar_lea.vmem %s1264_s15, 128  ;;  %s1088_s11 = smov [#allocation2]  }
  0x4b   : > { %p923_p12 = scmp.ne.s32.totalorder %s1264_s15, %s922_s1  ;;  %s927_s16 = sshll.u32 %s1088_s11, 4  ;;  %s928_s16 = int_to_ptr.vmem [resolvable:$false] %s927_s16 }
  0x4c   : > { %s929_s8 = scalar_lea.vmem %s928_s16, 256  ;;  %p930_p9 = scmp.lt.s32.totalorder %s1264_s15, %s928_s16 }
  0x4d   : > { %p925_p1 = pnand %p923_p12, %p1225_p4  ;;  %p931_p2 = scmp.lt.s32.totalorder %s929_s8, %s922_s1 }
  0x4f   : > { %p926_p8 = pneg %p925_p1  ;;  %p932_p6 = por %p931_p2, %p930_p9 }
  0x51   : > { %p933_p13 = pnand %p932_p6, %p926_p8 }
  0x53   : > { %936 = shalt.err (!%p933_p13)
}
  0x54   : > { %806 = dma.hbm_to_vmem [thread:$0]  (!%p1203_p0), %s1261_s13, 128, %s1264_s15, %s223_s22  }
  0x55   : > { %s263_s23 = scalar_lea.vmem [#allocation7], %s1196_s10  ;;  %s937_s25 = scalar_lea.hbm %s1270_s26, 128 }
  0x56   : > { %s270_s7 = sshll.u32 %s263_s23, 4  ;;  %p938_p11 = scmp.ne.s32.totalorder %s1270_s26, %s937_s25  ;;  %s271_s7 = int_to_ptr.vmem [resolvable:$true] %s270_s7 }
  0x57   : > { %s942_s14 = scalar_lea.hbm %s1431_s2, 256  ;;  %p943_p5 = scmp.lt.u32.totalorder %s1270_s26, %s1431_s2 }
  0x58   : > { %p940_p2 = pnand %p938_p11, %p1225_p4  ;;  %p944_p7 = scmp.lt.u32.totalorder %s942_s14, %s937_s25 }
  0x59   : > { %p946_p12 = scmp.lt.u32.totalorder %s937_s25, %s1270_s26 }
  0x5a   : > { %p941_p3 = pneg %p940_p2  ;;  %p945_p10 = por %p944_p7, %p943_p5 }
  0x5c   : > { %p947_p1 = por %p946_p12, %p945_p10 }
  0x5e   : > { %p948_p8 = pnand %p947_p1, %p941_p3 }
  0x60   : > { %951 = shalt.err (!%p948_p8)
}
  0x61   : > { %s952_s22 = scalar_lea.vmem %s271_s7, 128  ;;  %s1089_s10 = smov [#allocation7]  }
  0x62   : > { %p953_p9 = scmp.ne.s32.totalorder %s271_s7, %s952_s22  ;;  %s957_s13 = sshll.u32 %s1089_s10, 4  ;;  %s958_s13 = int_to_ptr.vmem [resolvable:$false] %s957_s13 }
  0x63   : > { %s959_s15 = scalar_lea.vmem %s958_s13, 256  ;;  %p960_p11 = scmp.lt.s32.totalorder %s271_s7, %s958_s13 }
  0x64   : > { %p955_p6 = pnand %p953_p9, %p1225_p4  ;;  %p961_p2 = scmp.lt.s32.totalorder %s959_s15, %s952_s22 }
  0x66   : > { %p956_p13 = pneg %p955_p6  ;;  %p962_p0 = por %p961_p2, %p960_p11 }
  0x68   : > { %p963_p5 = pnand %p962_p0, %p956_p13 }
  0x6a   : > { %966 = shalt.err (!%p963_p5)
}
  0x6b   : > { %p1461_p7 = scmp.ne.s32.totalorder %s1454_s12, 0  ;;  %p1462_p3 = scmp.ne.s32.totalorder %s1459_s9, 0 }
  0x6c   : > { %s1317_s29 = sand.u32 (!%p1462_p3), 1, %s1069_s19   ;;  %p1463_p0 = scmp.ne.s32.totalorder (!%p1462_p3), %s1449_s30, 0 }
  0x6d   : > { %812 = dma.hbm_to_vmem [thread:$0]  (!%p1461_p7), %s1270_s26, 128, %s271_s7, %s1219_s27  }
  0x6e   : > { %289 = sbr.rel (%p1462_p3) target bundleno = 886 (0x376), region = 36  ;;  %s1320_s16 = sshll.u32 (!%p1462_p3), %s1317_s29, 3 }
  0x6f   : > { %s292_s8 = scalar_lea.sflag (!%p1462_p3), [#allocation3], %s1317_s29  ;;  %s295_s23 = scalar_lea.vmem (!%p1462_p3), [#allocation2], %s1320_s16 }
  0x75   : > { %1048 = dma.done.wait (%p1463_p0), %s292_s8, 128  }
  0x76   : > { %1050 = vsyncadd (%p1463_p0), %s292_s8, 4294967168  ;;  %s300_s12 = sand.u32 1, %s1156_s24   ;;  %s304_s9 = scalar_lea.vmem [#allocation5], %s1320_s16 }
  0x77   : > { %s301_s27 = scalar_lea.sflag [#allocation6], %s300_s12 }
  0x78   : > { %1052 = dma.done.wait (%p1463_p0), %s301_s27, 256  }
  0x79   : > { %1054 = vsyncadd (%p1463_p0), %s301_s27, 4294967040  ;;  %v1090_v0 = vmov 0.0   ;;  %vm1091_vm0 = vmmov 0   ;;  %vm375_vm1 = vcmask 261120   ;;  %v372_v1 = vld [vmem:[%s304_s9] sm:$0xff]  ;;  %v371_v2 = vld [vmem:[%s295_s23] sm:$0xff] }
  0x7a   : > { %783 = vmatprep.subr.mxu0 %v1090_v0  ;;  %785 = vmatprep.mubr.msk.f32.mxu0 %vm1091_vm0, %v1090_v0  ;;  %v374_v3 = vmul.f32 0.17677669, %v371_v2  ;;  %p362_p4 = scmp.lt.s32.totalorder %s1077_s21, 1  ;;  %v1092_v5 = vmov 0   ;;  %vm458_vm4 = vcmask 64512   ;;  %s313_s28 = scalar_lea.vmem [#allocation7], %s1320_s16 }
  0x7b   : > { %788 = vmatprep.subr.mxu1 %v1090_v0  ;;  %790 = vmatprep.mubr.msk.f32.mxu1 %vm1091_vm0, %v1090_v0  ;;  %v373_v17 = vld [vmem:[%s313_s28] sm:$0xff]  ;;  %s361_s17 = scalar_lea.vmem [#allocation9], %s1320_s16  ;;  %s775_s14 = sshll.u32 %s1077_s21, 7 }
  0x7c   : > { %784 = vmatpush3.xpose.msk.msra.mxu0 %vm375_vm1, %v372_v1  ;;  %s363_s24 = scalar_select %p362_p4, %s1077_s21, 1  ;;  %789 = vmatpush3.msra.mxu1 %v373_v17 }
  0x7d   : > { %s1353_s22 = scalar_lea.hbm %s1434_s5, %s775_s14  ;;  %s582_s10 = sshll.u32 %s361_s17, 4  ;;  %s583_s10 = int_to_ptr.vmem [resolvable:$true] %s582_s10 }
  0x7e   : > { %s769_s30 = sshll.u32 %s363_s24, 1  ;;  %s554_s13 = scalar_lea.sflag [#allocation10], %s1317_s29 }
  0x7f   : > { %786 = vmatmul.mubr.msk.f32.vlgmr.msra.gmra.mrb[0].mxu0 %vm375_vm1, %v374_v3  ;;  %s368_s25 = scalar_lea.vmem %s1432_s3, %s769_s30  ;;  %s967_s15 = scalar_lea.vmem %s583_s10, 128 }
  0x80   : > { %v452_v4 = vld [vmem:[%s368_s25] sm:$0x3]  ;;  %p968_p10 = scmp.ne.s32.totalorder %s583_s10, %s967_s15  ;;  %p1464_p12 = scmp.ne.s32.totalorder %s1450_s6, 0 }
  0x81   : > { %vm453_vm2 = vnez %v452_v4  ;;  %s1093_s8 = smov [#allocation9]  }
  0x82   : > { %v454_v6 = vsel %vm453_vm2, 16843009, %v1092_v5  ;;  %p969_p1 = pnand %p968_p10, %p1464_p12  ;;  %s971_s23 = sshll.u32 %s1093_s8, 4  ;;  %s972_s23 = int_to_ptr.vmem [resolvable:$false] %s971_s23 }
  0x83   : > { %v455_v7 = vunpack.c.0.s8 %v454_v6  ;;  %s973_s12 = scalar_lea.vmem %s972_s23, 256  ;;  %p974_p9 = scmp.lt.s32.totalorder %s583_s10, %s972_s23 }
  0x84   : > { %p970_p8 = pneg %p969_p1  ;;  %p975_p6 = scmp.lt.s32.totalorder %s973_s12, %s967_s15 }
  0x85   : > { %vm456_vm3 = vcmp.ne.s32.totalorder %v455_v7, 0 }
  0x86   : > { %p976_p13 = por %p975_p6, %p974_p9 }
  0x88   : > { %p977_p11 = pnand %p976_p13, %p970_p8 }
 0x152   : > { %v448_v8 = vpop.f32.mrb[0].mxu0 }
 0x153   : > { %v457_v9 = vsel %vm456_vm3, -1e+30, %v448_v8  ;;  %v787_v10 = vpop.f32.mrb[1].mxu0 }
 0x154   : > { %v459_v11 = vsel %vm458_vm4, %v457_v9, -inf }
 0x155   : > { %460 = vmax.xlane.f32.xlu0 %v459_v11 }
 0x1e2   : > { %v461_v12 = vpop.xlane.xlu0 %460 }
 0x1e3   : > { %v462_v13 = vsub.f32 %v457_v9, %v461_v12 }
 0x1e5   : > { %v463_v14 = vmul.f32 1.442695, %v462_v13 }
 0x1e7   : > { %873 = vpow2.f32 %v463_v14 }
 0x1f1   : > { %v874_v15 = vpop.eup %873 }
 0x1f2   : > { %v465_v16 = vsel %vm458_vm4, %v874_v15, 0.0 }
 0x1f3   : > { %466 = vadd.xlane.f32.xlu0 %v465_v16 }
 0x280   : > { %v467_v18 = vpop.xlane.xlu0 %466 }
 0x281   : > { %875 = vrcp.f32 %v467_v18 }
 0x28b   : > { %v876_v19 = vpop.eup %875 }
 0x28c   : > { %v469_v20 = vmul.f32 %v876_v19, %v467_v18 }
 0x28e   : > { %v470_v21 = vsub.f32 2.0, %v469_v20 }
 0x290   : > { %v471_v22 = vmul.f32 %v876_v19, %v470_v21 }
 0x292   : > { %v472_v23 = vmul.f32 %v874_v15, %v471_v22 }
 0x294   : > { %791 = vmatmul.mubr.msk.f32.vlgmr.msra.gmra.mrb[0].mxu1 %vm458_vm4, %v472_v23  ;;  %547 = vst.msk [vmem:[%s361_s17] sm:$0xff] %vm458_vm4, %v472_v23 }
 0x295   : > { %980 = shalt.err (!%p977_p11)
}
 0x296   : > { %s981_s27 = scalar_lea.hbm %s1353_s22, 128  ;;  %s985_s30 = scalar_lea.hbm %s1434_s5, 256 }
 0x297   : > { %p982_p2 = scmp.ne.s32.totalorder %s1353_s22, %s981_s27  ;;  %p986_p3 = scmp.lt.u32.totalorder %s1353_s22, %s1434_s5 }
 0x298   : > { %p987_p0 = scmp.lt.u32.totalorder %s985_s30, %s981_s27  ;;  %p989_p10 = scmp.lt.u32.totalorder %s981_s27, %s1353_s22 }
 0x299   : > { %p983_p5 = pnand %p982_p2, %p1464_p12 }
 0x29a   : > { %p988_p4 = por %p987_p0, %p986_p3 }
 0x29b   : > { %p984_p7 = pneg %p983_p5 }
 0x29c   : > { %p990_p1 = por %p989_p10, %p988_p4 }
 0x29e   : > { %p991_p8 = pnand %p990_p1, %p984_p7 }
 0x2a0   : > { %994 = shalt.err (!%p991_p8)
}
 0x2a1   : > { %800 = dma.vmem_to_hbm [thread:$0]  (%p1464_p12), %s583_s10, 128, %s1353_s22, %s554_s13  }
 0x2a2   : > { %s354_s25 = scalar_lea.vmem [#allocation8], %s1320_s16  ;;  %s1379_s11 = scalar_lea.hbm %s1433_s4, %s775_s14 }
 0x2a3   : > { %s568_s28 = sshll.u32 %s354_s25, 4  ;;  %s549_s15 = scalar_lea.sflag [#allocation4], %s1317_s29  ;;  %s1381_s28 = int_to_ptr.vmem [resolvable:$true] %s568_s28 }
 0x2a4   : > { %s995_s8 = scalar_lea.vmem %s1381_s28, 128  ;;  %s1094_s21 = smov [#allocation8]  }
 0x2a5   : > { %p996_p9 = scmp.ne.s32.totalorder %s1381_s28, %s995_s8  ;;  %s999_s16 = sshll.u32 %s1094_s21, 4  ;;  %s1000_s16 = int_to_ptr.vmem [resolvable:$false] %s999_s16 }
 0x2a6   : > { %s1001_s14 = scalar_lea.vmem %s1000_s16, 256  ;;  %p1002_p11 = scmp.lt.s32.totalorder %s1381_s28, %s1000_s16 }
 0x2a7   : > { %p997_p6 = pnand %p996_p9, %p1464_p12  ;;  %p1003_p2 = scmp.lt.s32.totalorder %s1001_s14, %s995_s8 }
 0x2a9   : > { %p998_p13 = pneg %p997_p6  ;;  %p1004_p5 = por %p1003_p2, %p1002_p11 }
 0x2ab   : > { %p1005_p7 = pnand %p1004_p5, %p998_p13 }
 0x367   : > { %v542_v24 = vpop.f32.mrb[0].mxu1 }
 0x368   : > { %546 = vst.msk [vmem:[%s354_s25] sm:$0xff] %vm375_vm1, %v542_v24  ;;  %v792_v25 = vpop.f32.mrb[1].mxu1 }
 0x369   : > { %1008 = shalt.err (!%p1005_p7)
}
 0x36a   : > { %s1009_s29 = scalar_lea.hbm %s1379_s11, 128  ;;  %s1013_s13 = scalar_lea.hbm %s1433_s4, 256 }
 0x36b   : > { %p1010_p3 = scmp.ne.s32.totalorder %s1379_s11, %s1009_s29  ;;  %p1014_p10 = scmp.lt.u32.totalorder %s1379_s11, %s1433_s4 }
 0x36c   : > { %p1015_p1 = scmp.lt.u32.totalorder %s1013_s13, %s1009_s29  ;;  %p1017_p9 = scmp.lt.u32.totalorder %s1009_s29, %s1379_s11 }
 0x36d   : > { %p1011_p0 = pnand %p1010_p3, %p1464_p12 }
 0x36e   : > { %p1016_p8 = por %p1015_p1, %p1014_p10 }
 0x36f   : > { %p1012_p4 = pneg %p1011_p0 }
 0x370   : > { %p1018_p6 = por %p1017_p9, %p1016_p8 }
 0x372   : > { %p1019_p13 = pnand %p1018_p6, %p1012_p4 }
 0x374   : > { %1022 = shalt.err (!%p1019_p13)
}
 0x375   : > { %799 = dma.vmem_to_hbm [thread:$0]  (%p1464_p12), %s1381_s28, 128, %s1379_s11, %s549_s15  }
 0x376 PF: > { %s1465_s27 = sld [smem:[#allocation19_spill]]  ;;  %s1466_s9 = sld [smem:[#allocation16_spill]] }
 0x377   : > { %s594_s24 = sand.u32 1, %s1065_s18  }
 0x378   : > { %s595_s30 = scalar_lea.sflag [#allocation4], %s594_s24 }
 0x37c   : > { %p1467_p11 = scmp.ne.s32.totalorder %s1465_s27, 0  ;;  %p1468_p2 = scmp.ge.s32.totalorder %s1466_s9, 2 }
 0x37e   : > { %p814_p5 = pnand %p1468_p2, %p1467_p11 }
 0x380   : > { %1056 = dma.done.wait (!%p814_p5), %s595_s30, 128  }
 0x381   : > { %1058 = vsyncadd (!%p814_p5), %s595_s30, 4294967168  ;;  %s604_s26 = scalar_lea.sflag [#allocation10], %s594_s24 }
 0x382   : > { %1060 = dma.done.wait (!%p814_p5), %s604_s26, 128  }
 0x383   : > { %1062 = vsyncadd (!%p814_p5), %s604_s26, 4294967168  ;;  %s28_s23 = sadd.s32 1, %s1466_s9   ;;  %s1469_s6 = sld [smem:[#allocation18_spill]] }
 0x384   : > { %p25_p7 = scmp.ge.s32.totalorder %s28_s23, 4   ;;  %s1470_s21 = sld [smem:[#allocation15_spill]] }
 0x385   : > { %s1471_s22 = sld [smem:[#allocation17_spill]]  ;;  %s1472_s18 = smov %s1069_s19 }
 0x386   : > { %s1473_s19 = smov %s1073_s20  ;;  %27 = sbr.rel (!%p25_p7) target bundleno = 12 (0xc), region = 125 }
 0x389   : > { %s1474_s20 = smov %s1469_s6 }
 0x38d   :  { %609 = vsyncpa [#allocation3], 1 }
 0x38e   :  { %611 = vsyncpa [#allocation3 + $0x1], 1 }
 0x38f   :  { %612 = vsyncpa [#allocation6], 1 }
 0x390   :  { %614 = vsyncpa [#allocation6 + $0x1], 1 }
 0x391   :  { %615 = vsyncpa [#allocation4], 1 }
 0x392   :  { %617 = vsyncpa [#allocation4 + $0x1], 1 }
 0x393   :  { %618 = vsyncpa [#allocation10], 1 }
 0x394   :  { %620 = vsyncpa [#allocation10 + $0x1], 1 }

</bundles_post_ra>
